<compile_context>
chip_gen: v7x
topology: tpu7x:2x2x1
jax: 0.10.0
libtpu: 0.0.40
codegen_flags: <defaults>
</compile_context>

<pallas_src>
import jax
import jax.numpy as jnp
from jax import lax
from jax.experimental import pallas as pl
from jax.experimental.pallas import tpu as pltpu


def _round_up(x, m):
    return ((x + m - 1) // m) * m


def _pad_to(x, target_shape):
    pads = [(0, t - s) for s, t in zip(x.shape, target_shape)]
    return jnp.pad(x, pads)


def text_rnn_kernel(emb_ref, wih_ref, bcomb_ref, h0_ref, whh_ref, wout_ref,
                    bout_ref, out_ref, h_scr, pre_scr):
    """One (batch_tile, seq_chunk) grid step.

    emb_ref  : (TS, BT, E)  bf16 time-major embedding chunk
    wih_ref  : (E, Hp)      bf16 W_ih^T (lane-padded)
    bcomb_ref: (1, Hp)      f32  b_ih + b_hh
    h0_ref   : (BT, Hp)     f32  initial hidden state for this batch tile
    whh_ref  : (Hp, Hp)     bf16 W_hh^T
    wout_ref : (Hp, Cp)     bf16 W_out^T
    bout_ref : (1, Cp)      f32  b_out
    out_ref  : (BT, Cp)     f32  logits (written at the last seq chunk)
    h_scr    : (BT, Hp)     f32  hidden-state carry across seq chunks
    pre_scr  : (TS, BT, Hp) f32  per-chunk pre-activations (x_t @ W_ih^T + b)
    """
    s = pl.program_id(1)
    ts = pre_scr.shape[0]
    unroll = min(ts, 8)

    @pl.when(s == 0)
    def _():
        h_scr[...] = h0_ref[...]

    # ---- chunk input projection: independent across t, done before (and off)
    # the serial recurrence chain. Loop-invariant W_ih / bias hoisted once. ----
    wih = wih_ref[...]
    bcomb = bcomb_ref[...]

    def proj(t, carry):
        pre_scr[t] = (jnp.dot(emb_ref[t], wih,
                              preferred_element_type=jnp.float32) + bcomb)
        return carry

    lax.fori_loop(0, ts, proj, 0, unroll=unroll)

    # ---- serial recurrence: only h @ W_hh + tanh on the critical path.
    # W_hh loaded once per chunk (hoisted above the loop). h stays f32; it is
    # cast to bf16 only as the MXU LHS operand. ----
    whh = whh_ref[...]

    def step(t, h):
        hm = jnp.dot(h.astype(whh.dtype), whh,
                     preferred_element_type=jnp.float32)
        return jnp.tanh(pre_scr[t] + hm)

    h = lax.fori_loop(0, ts, step, h_scr[...], unroll=unroll)
    h_scr[...] = h

    # ---- output projection, only at the final sequence chunk ----
    @pl.when(s == pl.num_programs(1) - 1)
    def _():
        wout = wout_ref[...]
        out_ref[...] = (jnp.dot(h.astype(wout.dtype), wout,
                                preferred_element_type=jnp.float32)
                        + bout_ref[...])


def text_rnn_forward(input_ids, params, h0, *, ts_hint=8):
    """Full TextRNN forward (embedding gather in XLA, projection+RNN in Pallas)."""
    B, S = input_ids.shape
    V, E = params["embed"].shape
    H = params["w_hh"].shape[0]
    C = params["w_out"].shape[0]

    # Sequence chunk length must divide S exactly (padded timesteps would
    # corrupt the recurrence: tanh(0 + h @ W_hh) != h).
    ts = max(1, min(ts_hint, S))
    while S % ts:
        ts -= 1

    # Batch tiling: one tile if small, else 128-row tiles (parallel grid axis).
    if B <= 128:
        Bp = max(8, _round_up(B, 8))
        bt = Bp
    else:
        bt = 128
        Bp = _round_up(B, bt)
    Hp = max(128, _round_up(H, 128))
    Cp = max(128, _round_up(C, 128))

    nb = Bp // bt
    ns = S // ts

    # Pad only the SMALL operands; the streamed embeddings come out already
    # padded (and bf16) by gathering padded ids from a bf16 table.
    ids_p = jnp.pad(input_ids, ((0, Bp - B), (0, 0)))                  # pad rows with token 0
    emb_tm = jnp.take(params["embed"].astype(jnp.bfloat16),
                      ids_p.T, axis=0)                                 # (S, Bp, E) bf16

    h0_p = _pad_to(h0, (Bp, Hp)).astype(jnp.float32)
    wih_p = _pad_to(params["w_ih"].T, (E, Hp)).astype(jnp.bfloat16)    # (E, Hp)
    bcomb = _pad_to((params["b_ih"] + params["b_hh"]).reshape(1, H),
                    (1, Hp)).astype(jnp.float32)                       # (1, Hp)
    whh_p = _pad_to(params["w_hh"].T, (Hp, Hp)).astype(jnp.bfloat16)   # (Hp, Hp)
    wout_p = _pad_to(params["w_out"].T, (Hp, Cp)).astype(jnp.bfloat16) # (Hp, Cp)
    bout_p = _pad_to(params["b_out"].reshape(1, C),
                     (1, Cp)).astype(jnp.float32)                      # (1, Cp)

    logits_p = pl.pallas_call(
        text_rnn_kernel,
        out_shape=jax.ShapeDtypeStruct((Bp, Cp), jnp.float32),
        grid_spec=pltpu.PrefetchScalarGridSpec(
            num_scalar_prefetch=0,
            grid=(nb, ns),
            in_specs=[
                pl.BlockSpec((ts, bt, E), lambda b, s: (s, b, 0)),   # emb chunk
                pl.BlockSpec((E, Hp), lambda b, s: (0, 0)),          # W_ih^T
                pl.BlockSpec((1, Hp), lambda b, s: (0, 0)),          # b_ih + b_hh
                pl.BlockSpec((bt, Hp), lambda b, s: (b, 0)),         # h0
                pl.BlockSpec((Hp, Hp), lambda b, s: (0, 0)),         # W_hh^T
                pl.BlockSpec((Hp, Cp), lambda b, s: (0, 0)),         # W_out^T
                pl.BlockSpec((1, Cp), lambda b, s: (0, 0)),          # b_out
            ],
            out_specs=pl.BlockSpec((bt, Cp), lambda b, s: (b, 0)),
            scratch_shapes=[
                pltpu.VMEM((bt, Hp), jnp.float32),       # hidden-state carry
                pltpu.VMEM((ts, bt, Hp), jnp.float32),   # chunk pre-activations
            ],
        ),
        compiler_params=pltpu.CompilerParams(
            dimension_semantics=("parallel", "arbitrary"),
            vmem_limit_bytes=32 * 1024 * 1024,
        ),
    )(emb_tm, wih_p, bcomb, h0_p, whh_p, wout_p, bout_p)

    return logits_p[:B, :C]


def make_params(key, vocab_size, embedding_dim, hidden_size, num_of_class):
    ks = jax.random.split(key, 7)
    scale = 0.1
    return {
        "embed": scale * jax.random.normal(ks[0], (vocab_size, embedding_dim), jnp.float32),
        "w_ih": scale * jax.random.normal(ks[1], (hidden_size, embedding_dim), jnp.float32),
        "w_hh": scale * jax.random.normal(ks[2], (hidden_size, hidden_size), jnp.float32),
        "b_ih": scale * jax.random.normal(ks[3], (hidden_size,), jnp.float32),
        "b_hh": scale * jax.random.normal(ks[4], (hidden_size,), jnp.float32),
        "w_out": scale * jax.random.normal(ks[5], (num_of_class, hidden_size), jnp.float32),
        "b_out": scale * jax.random.normal(ks[6], (num_of_class,), jnp.float32),
    }


def reference_forward(input_ids, params, h0):
    """Pure-JAX f32 reference implementing the same PyTorch semantics."""
    emb = jnp.take(params["embed"], input_ids, axis=0)         # (B, S, E)

    def step(h, x_t):
        h_new = jnp.tanh(x_t @ params["w_ih"].T + params["b_ih"]
                         + h @ params["w_hh"].T + params["b_hh"])
        return h_new, None

    xs = jnp.transpose(emb, (1, 0, 2))                         # (S, B, E)
    hn, _ = lax.scan(step, h0, xs)
    return hn @ params["w_out"].T + params["b_out"]


if __name__ == "__main__":
    # Small, forward-consistent shapes.
    vocab_size, embedding_dim, hidden_size, num_of_class = 50, 16, 32, 4
    batch_size, seq_len = 2, 8

    key = jax.random.PRNGKey(0)
    k_params, k_ids, k_h0 = jax.random.split(key, 3)

    params = make_params(k_params, vocab_size, embedding_dim, hidden_size, num_of_class)
    input_ids = jax.random.randint(k_ids, (batch_size, seq_len), 0, vocab_size, jnp.int32)
    # torch.randn(1, B, H) initial hidden -> deterministic substitute, squeezed to (B, H)
    h0 = jax.random.normal(k_h0, (batch_size, hidden_size), jnp.float32)

    logits = text_rnn_forward(input_ids, params, h0)
    logits = jax.block_until_ready(logits)

    ref = reference_forward(input_ids, params, h0)
    assert logits.shape == (batch_size, num_of_class)
    # bf16 MXU operands (f32 accumulation / f32 tanh) -> loosened tolerance.
    assert jnp.allclose(logits, ref, atol=2e-2, rtol=2e-2), (logits, ref)

    print("KERNEL_OK")
</pallas_src>

<mosaic_0001>
module attributes {stable_mosaic.version = 11 : i64} {
  func.func @text_rnn_kernel(%arg0: i32, %arg1: i32, %arg2: memref<8x8x16xbf16, #tpu.memory_space<vmem>>, %arg3: memref<16x128xbf16, #tpu.memory_space<vmem>>, %arg4: memref<1x128xf32, #tpu.memory_space<vmem>>, %arg5: memref<8x128xf32, #tpu.memory_space<vmem>>, %arg6: memref<128x128xbf16, #tpu.memory_space<vmem>>, %arg7: memref<128x128xbf16, #tpu.memory_space<vmem>>, %arg8: memref<1x128xf32, #tpu.memory_space<vmem>>, %arg9: memref<8x128xf32, #tpu.memory_space<vmem>>, %arg10: memref<8x128xf32, #tpu.memory_space<vmem>>, %arg11: memref<8x8x128xf32, #tpu.memory_space<vmem>>) attributes {dimension_semantics = [#tpu.dimension_semantics<parallel>, #tpu.dimension_semantics<arbitrary>], iteration_bounds = array<i64: 1, 1>, scalar_prefetch = 0 : i64, scratch_operands = 2 : i64, tpu.core_type = #tpu.core_type<tc>, window_params = [{transform_indices = @transform_0, window_bounds = array<i64: 8, 8, 16>}, {pipeline_mode = #tpu.pipeline_mode<synchronous>, transform_indices = @transform_1, window_bounds = array<i64: 16, 128>}, {pipeline_mode = #tpu.pipeline_mode<synchronous>, transform_indices = @transform_2, window_bounds = array<i64: 1, 128>}, {transform_indices = @transform_3, window_bounds = array<i64: 8, 128>}, {pipeline_mode = #tpu.pipeline_mode<synchronous>, transform_indices = @transform_4, window_bounds = array<i64: 128, 128>}, {pipeline_mode = #tpu.pipeline_mode<synchronous>, transform_indices = @transform_5, window_bounds = array<i64: 128, 128>}, {pipeline_mode = #tpu.pipeline_mode<synchronous>, transform_indices = @transform_6, window_bounds = array<i64: 1, 128>}, {transform_indices = @transform_7, window_bounds = array<i64: 8, 128>}]} {
    %c0_i32 = arith.constant 0 : i32
    %0 = arith.cmpi eq, %arg1, %c0_i32 : i32
    %1 = arith.extui %0 : i1 to i32
    %c0_i32_0 = arith.constant 0 : i32
    %2 = arith.cmpi ne, %1, %c0_i32_0 : i32
    scf.if %2 {
      %c0_85 = arith.constant 0 : index
      %c0_86 = arith.constant 0 : index
      %147 = vector.load %arg5[%c0_85, %c0_86] : memref<8x128xf32, #tpu.memory_space<vmem>>, vector<8x128xf32>
      %c0_87 = arith.constant 0 : index
      %c0_88 = arith.constant 0 : index
      %148 = vector.load %arg10[%c0_87, %c0_88] : memref<8x128xf32, #tpu.memory_space<vmem>>, vector<8x128xf32>
      tpu.vector_store %arg10[%c0_87, %c0_88], %147 {strides = array<i32>} : memref<8x128xf32, #tpu.memory_space<vmem>>, vector<8x128xf32>,
    } else {
    }
    %c0 = arith.constant 0 : index
    %c0_1 = arith.constant 0 : index
    %3 = vector.load %arg3[%c0, %c0_1] : memref<16x128xbf16, #tpu.memory_space<vmem>>, vector<16x128xbf16>
    %c0_2 = arith.constant 0 : index
    %c0_3 = arith.constant 0 : index
    %4 = vector.load %arg4[%c0_2, %c0_3] : memref<1x128xf32, #tpu.memory_space<vmem>>, vector<1x128xf32>
    %c0_i32_4 = arith.constant 0 : i32
    %5 = arith.index_cast %c0_i32_4 : i32 to index
    %c0_5 = arith.constant 0 : index
    %c0_6 = arith.constant 0 : index
    %6 = vector.load %arg2[%5, %c0_5, %c0_6] : memref<8x8x16xbf16, #tpu.memory_space<vmem>>, vector<1x8x16xbf16>
    %7 = vector.shape_cast %6 : vector<1x8x16xbf16> to vector<8x16xbf16>
    %cst = arith.constant dense<0.000000e+00> : vector<8x128xf32>
    %8 = tpu.matmul %7, %3, %cst {dimension_numbers = #tpu.dot_dimension_numbers<[1], [0], [0], [1], [0, 0, 1, 1], [], []>} : vector<8x16xbf16>, vector<16x128xbf16>, vector<8x128xf32> -> vector<8x128xf32>
    %9 = vector.broadcast %4 : vector<1x128xf32> to vector<8x128xf32>
    %10 = arith.addf %8, %9 : vector<8x128xf32>
    %11 = arith.index_cast %c0_i32_4 : i32 to index
    %c0_7 = arith.constant 0 : index
    %c0_8 = arith.constant 0 : index
    %12 = vector.load %arg11[%11, %c0_7, %c0_8] : memref<8x8x128xf32, #tpu.memory_space<vmem>>, vector<1x8x128xf32>
    %13 = vector.shape_cast %12 : vector<1x8x128xf32> to vector<8x128xf32>
    %14 = vector.shape_cast %10 : vector<8x128xf32> to vector<1x8x128xf32>
    tpu.vector_store %arg11[%11, %c0_7, %c0_8], %14 {strides = array<i32>} : memref<8x8x128xf32, #tpu.memory_space<vmem>>, vector<1x8x128xf32>,
    %c1_i32 = arith.constant 1 : i32
    %15 = arith.index_cast %c1_i32 : i32 to index
    %c0_9 = arith.constant 0 : index
    %c0_10 = arith.constant 0 : index
    %16 = vector.load %arg2[%15, %c0_9, %c0_10] : memref<8x8x16xbf16, #tpu.memory_space<vmem>>, vector<1x8x16xbf16>
    %17 = vector.shape_cast %16 : vector<1x8x16xbf16> to vector<8x16xbf16>
    %cst_11 = arith.constant dense<0.000000e+00> : vector<8x128xf32>
    %18 = tpu.matmul %17, %3, %cst_11 {dimension_numbers = #tpu.dot_dimension_numbers<[1], [0], [0], [1], [0, 0, 1, 1], [], []>} : vector<8x16xbf16>, vector<16x128xbf16>, vector<8x128xf32> -> vector<8x128xf32>
    %19 = vector.broadcast %4 : vector<1x128xf32> to vector<8x128xf32>
    %20 = arith.addf %18, %19 : vector<8x128xf32>
    %21 = arith.index_cast %c1_i32 : i32 to index
    %c0_12 = arith.constant 0 : index
    %c0_13 = arith.constant 0 : index
    %22 = vector.load %arg11[%21, %c0_12, %c0_13] : memref<8x8x128xf32, #tpu.memory_space<vmem>>, vector<1x8x128xf32>
    %23 = vector.shape_cast %22 : vector<1x8x128xf32> to vector<8x128xf32>
    %24 = vector.shape_cast %20 : vector<8x128xf32> to vector<1x8x128xf32>
    tpu.vector_store %arg11[%21, %c0_12, %c0_13], %24 {strides = array<i32>} : memref<8x8x128xf32, #tpu.memory_space<vmem>>, vector<1x8x128xf32>,
    %c2_i32 = arith.constant 2 : i32
    %25 = arith.index_cast %c2_i32 : i32 to index
    %c0_14 = arith.constant 0 : index
    %c0_15 = arith.constant 0 : index
    %26 = vector.load %arg2[%25, %c0_14, %c0_15] : memref<8x8x16xbf16, #tpu.memory_space<vmem>>, vector<1x8x16xbf16>
    %27 = vector.shape_cast %26 : vector<1x8x16xbf16> to vector<8x16xbf16>
    %cst_16 = arith.constant dense<0.000000e+00> : vector<8x128xf32>
    %28 = tpu.matmul %27, %3, %cst_16 {dimension_numbers = #tpu.dot_dimension_numbers<[1], [0], [0], [1], [0, 0, 1, 1], [], []>} : vector<8x16xbf16>, vector<16x128xbf16>, vector<8x128xf32> -> vector<8x128xf32>
    %29 = vector.broadcast %4 : vector<1x128xf32> to vector<8x128xf32>
    %30 = arith.addf %28, %29 : vector<8x128xf32>
    %31 = arith.index_cast %c2_i32 : i32 to index
    %c0_17 = arith.constant 0 : index
    %c0_18 = arith.constant 0 : index
    %32 = vector.load %arg11[%31, %c0_17, %c0_18] : memref<8x8x128xf32, #tpu.memory_space<vmem>>, vector<1x8x128xf32>
    %33 = vector.shape_cast %32 : vector<1x8x128xf32> to vector<8x128xf32>
    %34 = vector.shape_cast %30 : vector<8x128xf32> to vector<1x8x128xf32>
    tpu.vector_store %arg11[%31, %c0_17, %c0_18], %34 {strides = array<i32>} : memref<8x8x128xf32, #tpu.memory_space<vmem>>, vector<1x8x128xf32>,
    %c3_i32 = arith.constant 3 : i32
    %35 = arith.index_cast %c3_i32 : i32 to index
    %c0_19 = arith.constant 0 : index
    %c0_20 = arith.constant 0 : index
    %36 = vector.load %arg2[%35, %c0_19, %c0_20] : memref<8x8x16xbf16, #tpu.memory_space<vmem>>, vector<1x8x16xbf16>
    %37 = vector.shape_cast %36 : vector<1x8x16xbf16> to vector<8x16xbf16>
    %cst_21 = arith.constant dense<0.000000e+00> : vector<8x128xf32>
    %38 = tpu.matmul %37, %3, %cst_21 {dimension_numbers = #tpu.dot_dimension_numbers<[1], [0], [0], [1], [0, 0, 1, 1], [], []>} : vector<8x16xbf16>, vector<16x128xbf16>, vector<8x128xf32> -> vector<8x128xf32>
    %39 = vector.broadcast %4 : vector<1x128xf32> to vector<8x128xf32>
    %40 = arith.addf %38, %39 : vector<8x128xf32>
    %41 = arith.index_cast %c3_i32 : i32 to index
    %c0_22 = arith.constant 0 : index
    %c0_23 = arith.constant 0 : index
    %42 = vector.load %arg11[%41, %c0_22, %c0_23] : memref<8x8x128xf32, #tpu.memory_space<vmem>>, vector<1x8x128xf32>
    %43 = vector.shape_cast %42 : vector<1x8x128xf32> to vector<8x128xf32>
    %44 = vector.shape_cast %40 : vector<8x128xf32> to vector<1x8x128xf32>
    tpu.vector_store %arg11[%41, %c0_22, %c0_23], %44 {strides = array<i32>} : memref<8x8x128xf32, #tpu.memory_space<vmem>>, vector<1x8x128xf32>,
    %c4_i32 = arith.constant 4 : i32
    %45 = arith.index_cast %c4_i32 : i32 to index
    %c0_24 = arith.constant 0 : index
    %c0_25 = arith.constant 0 : index
    %46 = vector.load %arg2[%45, %c0_24, %c0_25] : memref<8x8x16xbf16, #tpu.memory_space<vmem>>, vector<1x8x16xbf16>
    %47 = vector.shape_cast %46 : vector<1x8x16xbf16> to vector<8x16xbf16>
    %cst_26 = arith.constant dense<0.000000e+00> : vector<8x128xf32>
    %48 = tpu.matmul %47, %3, %cst_26 {dimension_numbers = #tpu.dot_dimension_numbers<[1], [0], [0], [1], [0, 0, 1, 1], [], []>} : vector<8x16xbf16>, vector<16x128xbf16>, vector<8x128xf32> -> vector<8x128xf32>
    %49 = vector.broadcast %4 : vector<1x128xf32> to vector<8x128xf32>
    %50 = arith.addf %48, %49 : vector<8x128xf32>
    %51 = arith.index_cast %c4_i32 : i32 to index
    %c0_27 = arith.constant 0 : index
    %c0_28 = arith.constant 0 : index
    %52 = vector.load %arg11[%51, %c0_27, %c0_28] : memref<8x8x128xf32, #tpu.memory_space<vmem>>, vector<1x8x128xf32>
    %53 = vector.shape_cast %52 : vector<1x8x128xf32> to vector<8x128xf32>
    %54 = vector.shape_cast %50 : vector<8x128xf32> to vector<1x8x128xf32>
    tpu.vector_store %arg11[%51, %c0_27, %c0_28], %54 {strides = array<i32>} : memref<8x8x128xf32, #tpu.memory_space<vmem>>, vector<1x8x128xf32>,
    %c5_i32 = arith.constant 5 : i32
    %55 = arith.index_cast %c5_i32 : i32 to index
    %c0_29 = arith.constant 0 : index
    %c0_30 = arith.constant 0 : index
    %56 = vector.load %arg2[%55, %c0_29, %c0_30] : memref<8x8x16xbf16, #tpu.memory_space<vmem>>, vector<1x8x16xbf16>
    %57 = vector.shape_cast %56 : vector<1x8x16xbf16> to vector<8x16xbf16>
    %cst_31 = arith.constant dense<0.000000e+00> : vector<8x128xf32>
    %58 = tpu.matmul %57, %3, %cst_31 {dimension_numbers = #tpu.dot_dimension_numbers<[1], [0], [0], [1], [0, 0, 1, 1], [], []>} : vector<8x16xbf16>, vector<16x128xbf16>, vector<8x128xf32> -> vector<8x128xf32>
    %59 = vector.broadcast %4 : vector<1x128xf32> to vector<8x128xf32>
    %60 = arith.addf %58, %59 : vector<8x128xf32>
    %61 = arith.index_cast %c5_i32 : i32 to index
    %c0_32 = arith.constant 0 : index
    %c0_33 = arith.constant 0 : index
    %62 = vector.load %arg11[%61, %c0_32, %c0_33] : memref<8x8x128xf32, #tpu.memory_space<vmem>>, vector<1x8x128xf32>
    %63 = vector.shape_cast %62 : vector<1x8x128xf32> to vector<8x128xf32>
    %64 = vector.shape_cast %60 : vector<8x128xf32> to vector<1x8x128xf32>
    tpu.vector_store %arg11[%61, %c0_32, %c0_33], %64 {strides = array<i32>} : memref<8x8x128xf32, #tpu.memory_space<vmem>>, vector<1x8x128xf32>,
    %c6_i32 = arith.constant 6 : i32
    %65 = arith.index_cast %c6_i32 : i32 to index
    %c0_34 = arith.constant 0 : index
    %c0_35 = arith.constant 0 : index
    %66 = vector.load %arg2[%65, %c0_34, %c0_35] : memref<8x8x16xbf16, #tpu.memory_space<vmem>>, vector<1x8x16xbf16>
    %67 = vector.shape_cast %66 : vector<1x8x16xbf16> to vector<8x16xbf16>
    %cst_36 = arith.constant dense<0.000000e+00> : vector<8x128xf32>
    %68 = tpu.matmul %67, %3, %cst_36 {dimension_numbers = #tpu.dot_dimension_numbers<[1], [0], [0], [1], [0, 0, 1, 1], [], []>} : vector<8x16xbf16>, vector<16x128xbf16>, vector<8x128xf32> -> vector<8x128xf32>
    %69 = vector.broadcast %4 : vector<1x128xf32> to vector<8x128xf32>
    %70 = arith.addf %68, %69 : vector<8x128xf32>
    %71 = arith.index_cast %c6_i32 : i32 to index
    %c0_37 = arith.constant 0 : index
    %c0_38 = arith.constant 0 : index
    %72 = vector.load %arg11[%71, %c0_37, %c0_38] : memref<8x8x128xf32, #tpu.memory_space<vmem>>, vector<1x8x128xf32>
    %73 = vector.shape_cast %72 : vector<1x8x128xf32> to vector<8x128xf32>
    %74 = vector.shape_cast %70 : vector<8x128xf32> to vector<1x8x128xf32>
    tpu.vector_store %arg11[%71, %c0_37, %c0_38], %74 {strides = array<i32>} : memref<8x8x128xf32, #tpu.memory_space<vmem>>, vector<1x8x128xf32>,
    %c7_i32 = arith.constant 7 : i32
    %75 = arith.index_cast %c7_i32 : i32 to index
    %c0_39 = arith.constant 0 : index
    %c0_40 = arith.constant 0 : index
    %76 = vector.load %arg2[%75, %c0_39, %c0_40] : memref<8x8x16xbf16, #tpu.memory_space<vmem>>, vector<1x8x16xbf16>
    %77 = vector.shape_cast %76 : vector<1x8x16xbf16> to vector<8x16xbf16>
    %cst_41 = arith.constant dense<0.000000e+00> : vector<8x128xf32>
    %78 = tpu.matmul %77, %3, %cst_41 {dimension_numbers = #tpu.dot_dimension_numbers<[1], [0], [0], [1], [0, 0, 1, 1], [], []>} : vector<8x16xbf16>, vector<16x128xbf16>, vector<8x128xf32> -> vector<8x128xf32>
    %79 = vector.broadcast %4 : vector<1x128xf32> to vector<8x128xf32>
    %80 = arith.addf %78, %79 : vector<8x128xf32>
    %81 = arith.index_cast %c7_i32 : i32 to index
    %c0_42 = arith.constant 0 : index
    %c0_43 = arith.constant 0 : index
    %82 = vector.load %arg11[%81, %c0_42, %c0_43] : memref<8x8x128xf32, #tpu.memory_space<vmem>>, vector<1x8x128xf32>
    %83 = vector.shape_cast %82 : vector<1x8x128xf32> to vector<8x128xf32>
    %84 = vector.shape_cast %80 : vector<8x128xf32> to vector<1x8x128xf32>
    tpu.vector_store %arg11[%81, %c0_42, %c0_43], %84 {strides = array<i32>} : memref<8x8x128xf32, #tpu.memory_space<vmem>>, vector<1x8x128xf32>,
    %c8_i32 = arith.constant 8 : i32
    %c0_44 = arith.constant 0 : index
    %c0_45 = arith.constant 0 : index
    %85 = vector.load %arg6[%c0_44, %c0_45] : memref<128x128xbf16, #tpu.memory_space<vmem>>, vector<128x128xbf16>
    %c0_46 = arith.constant 0 : index
    %c0_47 = arith.constant 0 : index
    %86 = vector.load %arg10[%c0_46, %c0_47] : memref<8x128xf32, #tpu.memory_space<vmem>>, vector<8x128xf32>
    %c0_i32_48 = arith.constant 0 : i32
    %87 = arith.truncf %86 : vector<8x128xf32> to vector<8x128xbf16>
    %cst_49 = arith.constant dense<0.000000e+00> : vector<8x128xf32>
    %88 = tpu.matmul %87, %85, %cst_49 {dimension_numbers = #tpu.dot_dimension_numbers<[1], [0], [0], [1], [0, 0, 1, 1], [], []>} : vector<8x128xbf16>, vector<128x128xbf16>, vector<8x128xf32> -> vector<8x128xf32>
    %89 = arith.index_cast %c0_i32_48 : i32 to index
    %c0_50 = arith.constant 0 : index
    %c0_51 = arith.constant 0 : index
    %90 = vector.load %arg11[%89, %c0_50, %c0_51] : memref<8x8x128xf32, #tpu.memory_space<vmem>>, vector<1x8x128xf32>
    %91 = vector.shape_cast %90 : vector<1x8x128xf32> to vector<8x128xf32>
    %92 = arith.addf %91, %88 : vector<8x128xf32>
    %93 = math.tanh %92 : vector<8x128xf32>
    %c1_i32_52 = arith.constant 1 : i32
    %94 = arith.truncf %93 : vector<8x128xf32> to vector<8x128xbf16>
    %cst_53 = arith.constant dense<0.000000e+00> : vector<8x128xf32>
    %95 = tpu.matmul %94, %85, %cst_53 {dimension_numbers = #tpu.dot_dimension_numbers<[1], [0], [0], [1], [0, 0, 1, 1], [], []>} : vector<8x128xbf16>, vector<128x128xbf16>, vector<8x128xf32> -> vector<8x128xf32>
    %96 = arith.index_cast %c1_i32_52 : i32 to index
    %c0_54 = arith.constant 0 : index
    %c0_55 = arith.constant 0 : index
    %97 = vector.load %arg11[%96, %c0_54, %c0_55] : memref<8x8x128xf32, #tpu.memory_space<vmem>>, vector<1x8x128xf32>
    %98 = vector.shape_cast %97 : vector<1x8x128xf32> to vector<8x128xf32>
    %99 = arith.addf %98, %95 : vector<8x128xf32>
    %100 = math.tanh %99 : vector<8x128xf32>
    %c2_i32_56 = arith.constant 2 : i32
    %101 = arith.truncf %100 : vector<8x128xf32> to vector<8x128xbf16>
    %cst_57 = arith.constant dense<0.000000e+00> : vector<8x128xf32>
    %102 = tpu.matmul %101, %85, %cst_57 {dimension_numbers = #tpu.dot_dimension_numbers<[1], [0], [0], [1], [0, 0, 1, 1], [], []>} : vector<8x128xbf16>, vector<128x128xbf16>, vector<8x128xf32> -> vector<8x128xf32>
    %103 = arith.index_cast %c2_i32_56 : i32 to index
    %c0_58 = arith.constant 0 : index
    %c0_59 = arith.constant 0 : index
    %104 = vector.load %arg11[%103, %c0_58, %c0_59] : memref<8x8x128xf32, #tpu.memory_space<vmem>>, vector<1x8x128xf32>
    %105 = vector.shape_cast %104 : vector<1x8x128xf32> to vector<8x128xf32>
    %106 = arith.addf %105, %102 : vector<8x128xf32>
    %107 = math.tanh %106 : vector<8x128xf32>
    %c3_i32_60 = arith.constant 3 : i32
    %108 = arith.truncf %107 : vector<8x128xf32> to vector<8x128xbf16>
    %cst_61 = arith.constant dense<0.000000e+00> : vector<8x128xf32>
    %109 = tpu.matmul %108, %85, %cst_61 {dimension_numbers = #tpu.dot_dimension_numbers<[1], [0], [0], [1], [0, 0, 1, 1], [], []>} : vector<8x128xbf16>, vector<128x128xbf16>, vector<8x128xf32> -> vector<8x128xf32>
    %110 = arith.index_cast %c3_i32_60 : i32 to index
    %c0_62 = arith.constant 0 : index
    %c0_63 = arith.constant 0 : index
    %111 = vector.load %arg11[%110, %c0_62, %c0_63] : memref<8x8x128xf32, #tpu.memory_space<vmem>>, vector<1x8x128xf32>
    %112 = vector.shape_cast %111 : vector<1x8x128xf32> to vector<8x128xf32>
    %113 = arith.addf %112, %109 : vector<8x128xf32>
    %114 = math.tanh %113 : vector<8x128xf32>
    %c4_i32_64 = arith.constant 4 : i32
    %115 = arith.truncf %114 : vector<8x128xf32> to vector<8x128xbf16>
    %cst_65 = arith.constant dense<0.000000e+00> : vector<8x128xf32>
    %116 = tpu.matmul %115, %85, %cst_65 {dimension_numbers = #tpu.dot_dimension_numbers<[1], [0], [0], [1], [0, 0, 1, 1], [], []>} : vector<8x128xbf16>, vector<128x128xbf16>, vector<8x128xf32> -> vector<8x128xf32>
    %117 = arith.index_cast %c4_i32_64 : i32 to index
    %c0_66 = arith.constant 0 : index
    %c0_67 = arith.constant 0 : index
    %118 = vector.load %arg11[%117, %c0_66, %c0_67] : memref<8x8x128xf32, #tpu.memory_space<vmem>>, vector<1x8x128xf32>
    %119 = vector.shape_cast %118 : vector<1x8x128xf32> to vector<8x128xf32>
    %120 = arith.addf %119, %116 : vector<8x128xf32>
    %121 = math.tanh %120 : vector<8x128xf32>
    %c5_i32_68 = arith.constant 5 : i32
    %122 = arith.truncf %121 : vector<8x128xf32> to vector<8x128xbf16>
    %cst_69 = arith.constant dense<0.000000e+00> : vector<8x128xf32>
    %123 = tpu.matmul %122, %85, %cst_69 {dimension_numbers = #tpu.dot_dimension_numbers<[1], [0], [0], [1], [0, 0, 1, 1], [], []>} : vector<8x128xbf16>, vector<128x128xbf16>, vector<8x128xf32> -> vector<8x128xf32>
    %124 = arith.index_cast %c5_i32_68 : i32 to index
    %c0_70 = arith.constant 0 : index
    %c0_71 = arith.constant 0 : index
    %125 = vector.load %arg11[%124, %c0_70, %c0_71] : memref<8x8x128xf32, #tpu.memory_space<vmem>>, vector<1x8x128xf32>
    %126 = vector.shape_cast %125 : vector<1x8x128xf32> to vector<8x128xf32>
    %127 = arith.addf %126, %123 : vector<8x128xf32>
    %128 = math.tanh %127 : vector<8x128xf32>
    %c6_i32_72 = arith.constant 6 : i32
    %129 = arith.truncf %128 : vector<8x128xf32> to vector<8x128xbf16>
    %cst_73 = arith.constant dense<0.000000e+00> : vector<8x128xf32>
    %130 = tpu.matmul %129, %85, %cst_73 {dimension_numbers = #tpu.dot_dimension_numbers<[1], [0], [0], [1], [0, 0, 1, 1], [], []>} : vector<8x128xbf16>, vector<128x128xbf16>, vector<8x128xf32> -> vector<8x128xf32>
    %131 = arith.index_cast %c6_i32_72 : i32 to index
    %c0_74 = arith.constant 0 : index
    %c0_75 = arith.constant 0 : index
    %132 = vector.load %arg11[%131, %c0_74, %c0_75] : memref<8x8x128xf32, #tpu.memory_space<vmem>>, vector<1x8x128xf32>
    %133 = vector.shape_cast %132 : vector<1x8x128xf32> to vector<8x128xf32>
    %134 = arith.addf %133, %130 : vector<8x128xf32>
    %135 = math.tanh %134 : vector<8x128xf32>
    %c7_i32_76 = arith.constant 7 : i32
    %136 = arith.truncf %135 : vector<8x128xf32> to vector<8x128xbf16>
    %cst_77 = arith.constant dense<0.000000e+00> : vector<8x128xf32>
    %137 = tpu.matmul %136, %85, %cst_77 {dimension_numbers = #tpu.dot_dimension_numbers<[1], [0], [0], [1], [0, 0, 1, 1], [], []>} : vector<8x128xbf16>, vector<128x128xbf16>, vector<8x128xf32> -> vector<8x128xf32>
    %138 = arith.index_cast %c7_i32_76 : i32 to index
    %c0_78 = arith.constant 0 : index
    %c0_79 = arith.constant 0 : index
    %139 = vector.load %arg11[%138, %c0_78, %c0_79] : memref<8x8x128xf32, #tpu.memory_space<vmem>>, vector<1x8x128xf32>
    %140 = vector.shape_cast %139 : vector<1x8x128xf32> to vector<8x128xf32>
    %141 = arith.addf %140, %137 : vector<8x128xf32>
    %142 = math.tanh %141 : vector<8x128xf32>
    %c8_i32_80 = arith.constant 8 : i32
    %c0_81 = arith.constant 0 : index
    %c0_82 = arith.constant 0 : index
    %143 = vector.load %arg10[%c0_81, %c0_82] : memref<8x128xf32, #tpu.memory_space<vmem>>, vector<8x128xf32>
    tpu.vector_store %arg10[%c0_81, %c0_82], %142 {strides = array<i32>} : memref<8x128xf32, #tpu.memory_space<vmem>>, vector<8x128xf32>,
    %c0_i32_83 = arith.constant 0 : i32
    %144 = arith.cmpi eq, %arg1, %c0_i32_83 : i32
    %145 = arith.extui %144 : i1 to i32
    %c0_i32_84 = arith.constant 0 : i32
    %146 = arith.cmpi ne, %145, %c0_i32_84 : i32
    scf.if %146 {
      %c0_85 = arith.constant 0 : index
      %c0_86 = arith.constant 0 : index
      %147 = vector.load %arg7[%c0_85, %c0_86] : memref<128x128xbf16, #tpu.memory_space<vmem>>, vector<128x128xbf16>
      %148 = arith.truncf %142 : vector<8x128xf32> to vector<8x128xbf16>
      %cst_87 = arith.constant dense<0.000000e+00> : vector<8x128xf32>
      %149 = tpu.matmul %148, %147, %cst_87 {dimension_numbers = #tpu.dot_dimension_numbers<[1], [0], [0], [1], [0, 0, 1, 1], [], []>} : vector<8x128xbf16>, vector<128x128xbf16>, vector<8x128xf32> -> vector<8x128xf32>
      %c0_88 = arith.constant 0 : index
      %c0_89 = arith.constant 0 : index
      %150 = vector.load %arg8[%c0_88, %c0_89] : memref<1x128xf32, #tpu.memory_space<vmem>>, vector<1x128xf32>
      %151 = vector.broadcast %150 : vector<1x128xf32> to vector<8x128xf32>
      %152 = arith.addf %149, %151 : vector<8x128xf32>
      %c0_90 = arith.constant 0 : index
      %c0_91 = arith.constant 0 : index
      %153 = vector.load %arg9[%c0_90, %c0_91] : memref<8x128xf32, #tpu.memory_space<vmem>>, vector<8x128xf32>
      tpu.vector_store %arg9[%c0_90, %c0_91], %152 {strides = array<i32>} : memref<8x128xf32, #tpu.memory_space<vmem>>, vector<8x128xf32>,
    } else {
    }
    return
  }
  func.func @transform_0(%arg0: i32, %arg1: i32) -> (i32, i32, i32) {
    %c0_i32 = arith.constant 0 : i32
    %c0_i32_0 = arith.constant 0 : i32
    return %arg1, %arg0, %c0_i32 : i32, i32, i32
  }
  func.func @transform_1(%arg0: i32, %arg1: i32) -> (i32, i32) {
    %c0_i32 = arith.constant 0 : i32
    %c0_i32_0 = arith.constant 0 : i32
    %c0_i32_1 = arith.constant 0 : i32
    return %c0_i32, %c0_i32_0 : i32, i32
  }
  func.func @transform_2(%arg0: i32, %arg1: i32) -> (i32, i32) {
    %c0_i32 = arith.constant 0 : i32
    %c0_i32_0 = arith.constant 0 : i32
    %c0_i32_1 = arith.constant 0 : i32
    return %c0_i32, %c0_i32_0 : i32, i32
  }
  func.func @transform_3(%arg0: i32, %arg1: i32) -> (i32, i32) {
    %c0_i32 = arith.constant 0 : i32
    %c0_i32_0 = arith.constant 0 : i32
    return %arg0, %c0_i32 : i32, i32
  }
  func.func @transform_4(%arg0: i32, %arg1: i32) -> (i32, i32) {
    %c0_i32 = arith.constant 0 : i32
    %c0_i32_0 = arith.constant 0 : i32
    %c0_i32_1 = arith.constant 0 : i32
    return %c0_i32, %c0_i32_0 : i32, i32
  }
  func.func @transform_5(%arg0: i32, %arg1: i32) -> (i32, i32) {
    %c0_i32 = arith.constant 0 : i32
    %c0_i32_0 = arith.constant 0 : i32
    %c0_i32_1 = arith.constant 0 : i32
    return %c0_i32, %c0_i32_0 : i32, i32
  }
  func.func @transform_6(%arg0: i32, %arg1: i32) -> (i32, i32) {
    %c0_i32 = arith.constant 0 : i32
    %c0_i32_0 = arith.constant 0 : i32
    %c0_i32_1 = arith.constant 0 : i32
    return %c0_i32, %c0_i32_0 : i32, i32
  }
  func.func @transform_7(%arg0: i32, %arg1: i32) -> (i32, i32) {
    %c0_i32 = arith.constant 0 : i32
    %c0_i32_0 = arith.constant 0 : i32
    return %arg0, %c0_i32 : i32, i32
  }
}

</mosaic_0001>

<bundles_post_ra>
// kernel: tpu_custom_call.1
= control target key start
LH: loop header
LB: loop body
LE: loop exit
PB: predicated region body
PF: predicated region fallthrough
CT: control target
= control target key end

     0   :  { %12 = vsyncpa [#allocation5], 0  ;;  %s1932_s0 = inlined_call_operand.hbm [shape: bf16[8,8,16], index: 0, kind: input, shape index: {}]   ;;  %s1933_s1 = inlined_call_operand.hbm [shape: bf16[16,128], index: 1, kind: input, shape index: {}]   ;;  %s1934_s2 = inlined_call_operand.vmem [shape: f32[1,128], index: 2, kind: input, shape index: {}]   ;;  %s1935_s3 = inlined_call_operand.vmem [shape: f32[8,128], index: 3, kind: input, shape index: {}]   ;;  %s1936_s4 = inlined_call_operand.hbm [shape: bf16[128,128], index: 4, kind: input, shape index: {}]   ;;  %s1937_s5 = inlined_call_operand.hbm [shape: bf16[128,128], index: 5, kind: input, shape index: {}]   ;;  %s1938_s6 = inlined_call_operand.vmem [shape: f32[1,128], index: 6, kind: input, shape index: {}]   ;;  %s1939_s7 = inlined_call_operand.hbm [shape: f32[8,128], index: 7, kind: output, shape index: {}]  }
   0x1   :  { %13 = vsyncpa [#allocation8], 0 }
   0x2   :  { %14 = vsyncpa [#allocation11], 0 }
   0x3   :  { %15 = vsyncpa [#allocation6], 0  ;;  %s1576_s24 = smov [#allocation7]   ;;  %s1577_s26 = smov [#allocation4]  }
   0x4   :  { %s33_s25 = sshll.u32 %s1576_s24, 4  ;;  %s21_s27 = sshll.u32 %s1577_s26, 4  ;;  %s34_s25 = int_to_ptr.vmem [resolvable:$true] %s33_s25  ;;  %s1625_s27 = int_to_ptr.vmem [resolvable:$true] %s21_s27 }
   0x5   :  { %s1458_s30 = scalar_lea.hbm %s1933_s1, 128 }
   0x6   :  { %p1459_p0 = scmp.ne.s32.totalorder %s1933_s1, %s1458_s30  ;;  %p1462_p1 = scmp.lt.u32.totalorder %s1458_s30, %s1933_s1 }
   0x8   :  { %p1464_p2 = pnand %p1462_p1, %p1459_p0 }
   0xa   :  { %1467 = shalt.err (!%p1464_p2)
}
   0xb   :  { %s1468_s12 = scalar_lea.vmem %s34_s25, 128  ;;  %p1473_p4 = scmp.lt.s32.totalorder %s34_s25, %s34_s25 }
   0xc   :  { %p1469_p3 = scmp.ne.s32.totalorder %s34_s25, %s1468_s12  ;;  %p1474_p5 = scmp.lt.s32.totalorder %s1468_s12, %s1468_s12 }
   0xe   :  { %p1475_p6 = por %p1474_p5, %p1473_p4 }
  0x10   :  { %p1476_p7 = pnand %p1475_p6, %p1469_p3 }
  0x12   :  { %1479 = shalt.err (!%p1476_p7)
}
  0x13   :  { %s1578_s13 = smov 64   ;;  %s1579_s14 = smov 4  }
  0x14   :  { %39 = dma.hbm_to_vmem [thread:$0]  %s1933_s1, 128, %s34_s25, [#allocation8], %s1578_s13, %s1578_s13, %s1579_s14  }
  0x15   :  { %s1480_s19 = scalar_lea.hbm %s1932_s0, 512 }
  0x16   :  { %p1481_p8 = scmp.ne.s32.totalorder %s1932_s0, %s1480_s19  ;;  %p1484_p9 = scmp.lt.u32.totalorder %s1480_s19, %s1932_s0 }
  0x18   :  { %p1486_p10 = pnand %p1484_p9, %p1481_p8 }
  0x1a   :  { %1489 = shalt.err (!%p1486_p10)
}
  0x1b   :  { %s1490_s24 = scalar_lea.vmem %s1625_s27, 512  ;;  %p1495_p12 = scmp.lt.s32.totalorder %s1625_s27, %s1625_s27 }
  0x1c   :  { %p1491_p11 = scmp.ne.s32.totalorder %s1625_s27, %s1490_s24  ;;  %p1496_p13 = scmp.lt.s32.totalorder %s1490_s24, %s1490_s24 }
  0x1e   :  { %p1497_p0 = por %p1496_p13, %p1495_p12 }
  0x20   :  { %p1498_p1 = pnand %p1497_p0, %p1491_p11 }
  0x22   :  { %1501 = shalt.err (!%p1498_p1)
}
  0x23   :  { %27 = dma.hbm_to_vmem [thread:$0]  %s1932_s0, 512, %s1625_s27, [#allocation5], %s1578_s13, %s1578_s13, %s1579_s14  }
  0x24   :  { %s1580_s26 = smov [#allocation9]   ;;  %s1581_s29 = smov [#allocation10]  }
  0x25   :  { %s49_s28 = sshll.u32 %s1580_s26, 4  ;;  %s61_s30 = sshll.u32 %s1581_s29, 4  ;;  %s50_s28 = int_to_ptr.vmem [resolvable:$true] %s49_s28  ;;  %s1662_s30 = int_to_ptr.vmem [resolvable:$true] %s61_s30 }
  0x26   :  { %s1502_s10 = scalar_lea.hbm %s1936_s4, 1024 }
  0x27   :  { %p1503_p2 = scmp.ne.s32.totalorder %s1936_s4, %s1502_s10  ;;  %p1506_p3 = scmp.lt.u32.totalorder %s1502_s10, %s1936_s4 }
  0x29   :  { %p1508_p4 = pnand %p1506_p3, %p1503_p2 }
  0x2b   :  { %1511 = shalt.err (!%p1508_p4)
}
  0x2c   :  { %s1512_s0 = scalar_lea.vmem %s50_s28, 1024  ;;  %p1517_p6 = scmp.lt.s32.totalorder %s50_s28, %s50_s28 }
  0x2d   :  { %p1513_p5 = scmp.ne.s32.totalorder %s50_s28, %s1512_s0  ;;  %p1518_p7 = scmp.lt.s32.totalorder %s1512_s0, %s1512_s0 }
  0x2f   :  { %p1519_p8 = por %p1518_p7, %p1517_p6 }
  0x31   :  { %p1520_p9 = pnand %p1519_p8, %p1513_p5 }
  0x33   :  { %1523 = shalt.err (!%p1520_p9)
}
  0x34   :  { %55 = dma.hbm_to_vmem [thread:$0]  %s1936_s4, 1024, %s50_s28, [#allocation8], %s1578_s13, %s1578_s13, %s1579_s14  }
  0x35   :  { %s1524_s20 = scalar_lea.hbm %s1937_s5, 1024 }
  0x36   :  { %p1525_p10 = scmp.ne.s32.totalorder %s1937_s5, %s1524_s20  ;;  %p1528_p11 = scmp.lt.u32.totalorder %s1524_s20, %s1937_s5 }
  0x38   :  { %p1530_p12 = pnand %p1528_p11, %p1525_p10 }
  0x3a   :  { %1533 = shalt.err (!%p1530_p12)
}
  0x3b   :  { %s1534_s1 = scalar_lea.vmem %s1662_s30, 1024  ;;  %p1539_p0 = scmp.lt.s32.totalorder %s1662_s30, %s1662_s30 }
  0x3c   :  { %p1535_p13 = scmp.ne.s32.totalorder %s1662_s30, %s1534_s1  ;;  %p1540_p1 = scmp.lt.s32.totalorder %s1534_s1, %s1534_s1 }
  0x3e   :  { %p1541_p2 = por %p1540_p1, %p1539_p0 }
  0x40   :  { %p1542_p3 = pnand %p1541_p2, %p1535_p13 }
  0x42   :  { %1545 = shalt.err (!%p1542_p3)
}
  0x43   :  { %67 = dma.hbm_to_vmem [thread:$0]  %s1937_s5, 1024, %s1662_s30, [#allocation11], %s1578_s13, %s1578_s13, %s1579_s14  }
  0x44   :  { %1568 = dma.done.wait [#allocation5], 512  }
  0x45   :  { %1569 = vsyncadd [#allocation5], 4294966784 }
  0x46   :  { %1570 = dma.done.wait [#allocation8], 1152  }
  0x47   :  { %1571 = vsyncadd [#allocation8], 4294966144 }
  0x48   :  { %1572 = dma.done.wait [#allocation11], 1024  }
  0x49   :  { %1573 = vsyncadd [#allocation11], 4294966272  ;;  %v1582_v0 = vmov 0.0   ;;  %vm1583_vm0 = vmmov 0   ;;  %v1425_v1 = vld [vmem:[#allocation7] sm:$0xff]   ;;  %vm105_vm1 = vcmask 130048  }
  0x4a   :  { %1178 = vmatprep.subr.bf16.mxu0 %v1582_v0  ;;  %1180 = vmatprep.mubr.msk.bf16.mxu0 %vm1583_vm0, %v1582_v0  ;;  %v292_v2 = vld [vmem:[#allocation4 + $0x10] sm:$0xf]  ;;  %v92_v3 = vld [vmem:[#allocation4] sm:$0xf]  ;;  %v386_v4 = vld [vmem:[#allocation4 + $0x18] sm:$0xf] }
  0x4b   :  { %1154 = vmatprep.subr.bf16.mxu1 %v1582_v0  ;;  %1156 = vmatprep.mubr.msk.bf16.mxu1 %vm1583_vm0, %v1582_v0  ;;  %v1712_v5 = vld [vmem:[#allocation9] sm:$0xff]   ;;  %v1717_v6 = vld [vmem:[#allocation9 + $0x8] sm:$0xff]   ;;  %v151_v7 = vld [vmem:[#allocation4 + $0x4] sm:$0xf]  ;;  %s1584_s28 = smov [#allocation12]  }
  0x4c   :  { %1179 = vmatpush3.bf16.msra.mxu0 %v1425_v1  ;;  %1155 = vmatpush3.bf16.msra.mxu1 %v1425_v1  ;;  %v1726_v8 = vld [vmem:[#allocation9 + $0x10] sm:$0xff]   ;;  %v1733_v9 = vld [vmem:[#allocation9 + $0x18] sm:$0xff]   ;;  %v198_v10 = vld [vmem:[#allocation4 + $0x8] sm:$0xf]  ;;  %s1019_s29 = sshll.u32 %s1584_s28, 4  ;;  %s1020_s29 = int_to_ptr.vmem [resolvable:$true] %s1019_s29 }
  0x4d   :  { %1190 = vmatprep.subr.bf16.mxu0 %v1582_v0  ;;  %1160 = vmatprep.subr.bf16.mxu1 %v1582_v0  ;;  %v1738_v11 = vld [vmem:[#allocation9 + $0x20] sm:$0xff]   ;;  %v1745_v12 = vld [vmem:[#allocation9 + $0x28] sm:$0xff]   ;;  %v1750_v14 = vld [vmem:[#allocation9 + $0x30] sm:$0xff]   ;;  %s1546_s30 = scalar_lea.vmem %s1020_s29, 128  ;;  %p1551_p5 = scmp.lt.s32.totalorder %s1020_s29, %s1020_s29 }
  0x4e   :  { %v245_v13 = vld [vmem:[#allocation4 + $0xc] sm:$0xf]  ;;  %v1757_v15 = vld [vmem:[#allocation9 + $0x38] sm:$0xff]   ;;  %v339_v17 = vld [vmem:[#allocation4 + $0x14] sm:$0xf]  ;;  %p1547_p4 = scmp.ne.s32.totalorder %s1020_s29, %s1546_s30  ;;  %p1552_p6 = scmp.lt.s32.totalorder %s1546_s30, %s1546_s30 }
  0x4f   :  { %1181 = vmatmul.mubr.msk.bf16.vlgmr.msra.gmra.mrb[0].mxu0 %vm105_vm1, %v292_v2  ;;  %1157 = vmatmul.mubr.msk.bf16.vlgmr.msra.gmra.mrb[0].mxu1 %vm105_vm1, %v92_v3  ;;  %v87_v16 = vld [vmem:[%s1935_s3] sm:$0xff]  ;;  %v433_v19 = vld [vmem:[#allocation4 + $0x1c] sm:$0xf] }
  0x50   :  { %1191 = vmatpush3.bf16.msra.mxu0 %v1425_v1  ;;  %1192 = vmatprep.mubr.msk.bf16.mxu0 %vm1583_vm0, %v1582_v0  ;;  %v496_v18 = vpack.c.bf16 %v87_v16, %v87_v16  ;;  %v1809_v28 = vld [vmem:[%s1934_s2] ss:$0 sm:$0xff]  ;;  %p1553_p7 = por %p1552_p6, %p1551_p5 }
  0x51   :  { %1202 = vmatprep.subr.bf16.mxu0 %v1582_v0  ;;  %1161 = vmatpush3.bf16.msra.mxu1 %v1425_v1 }
  0x52   :  { %1162 = vmatprep.mubr.msk.bf16.mxu1 %vm1583_vm0, %v1582_v0  ;;  %1166 = vmatprep.subr.bf16.mxu1 %v1582_v0  ;;  %p1554_p8 = pnand %p1553_p7, %p1547_p4 }
  0x57   :  { %1193 = vmatmul.mubr.msk.bf16.vlgmr.msra.gmra.mrb[4].mxu0 %vm105_vm1, %v386_v4  ;;  %1163 = vmatmul.mubr.msk.bf16.vlgmr.msra.gmra.mrb[4].mxu1 %vm105_vm1, %v151_v7 }
  0x58   :  { %1203 = vmatpush3.bf16.msra.mxu0 %v1712_v5  ;;  %1218 = vmatprep.mubr.msk.bf16.mxu0 %vm1583_vm0, %v1582_v0 }
  0x59   :  { %1204 = vmatprep.subr.bf16.mxu0 %v1582_v0  ;;  %1167 = vmatpush3.bf16.msra.mxu1 %v1425_v1 }
  0x5a   :  { %1168 = vmatprep.mubr.msk.bf16.mxu1 %vm1583_vm0, %v1582_v0  ;;  %1172 = vmatprep.subr.bf16.mxu1 %v1582_v0 }
  0x5c   :  { %1205 = vmatpush3.bf16.msra.mxu0 %v1717_v6 }
  0x5d   :  { %1206 = vmatprep.subr.bf16.mxu0 %v1582_v0 }
  0x5f   :  { %1169 = vmatmul.mubr.msk.bf16.vlgmr.msra.gmra.mrb[8].mxu1 %vm105_vm1, %v198_v10  ;;  %v1434_v10 = vld [vmem:[#allocation10] sm:$0xff]  }
  0x60   :  { %1207 = vmatpush3.bf16.msra.mxu0 %v1726_v8  ;;  %1173 = vmatpush3.bf16.msra.mxu1 %v1425_v1 }
  0x61   :  { %1208 = vmatprep.subr.bf16.mxu0 %v1582_v0  ;;  %1174 = vmatprep.mubr.msk.bf16.mxu1 %vm1583_vm0, %v1582_v0 }
  0x62   :  { %1184 = vmatprep.subr.bf16.mxu1 %v1582_v0 }
  0x64   :  { %1209 = vmatpush3.bf16.msra.mxu0 %v1733_v9 }
  0x65   :  { %1210 = vmatprep.subr.bf16.mxu0 %v1582_v0 }
  0x67   :  { %1175 = vmatmul.mubr.msk.bf16.vlgmr.msra.gmra.mrb[12].mxu1 %vm105_vm1, %v245_v13  ;;  %v1437_v13 = vld [vmem:[#allocation10 + $0x18] sm:$0xff]  }
  0x68   :  { %1211 = vmatpush3.bf16.msra.mxu0 %v1738_v11  ;;  %1185 = vmatpush3.bf16.msra.mxu1 %v1425_v1 }
  0x69   :  { %1212 = vmatprep.subr.bf16.mxu0 %v1582_v0  ;;  %1186 = vmatprep.mubr.msk.bf16.mxu1 %vm1583_vm0, %v1582_v0 }
  0x6a   :  { %1196 = vmatprep.subr.bf16.mxu1 %v1582_v0 }
  0x6c   :  { %1213 = vmatpush3.bf16.msra.mxu0 %v1745_v12 }
  0x6d   :  { %1214 = vmatprep.subr.bf16.mxu0 %v1582_v0 }
  0x6f   :  { %1187 = vmatmul.mubr.msk.bf16.vlgmr.msra.gmra.mrb[16].mxu1 %vm105_vm1, %v339_v17 }
  0x70   :  { %1215 = vmatpush3.bf16.msra.mxu0 %v1750_v14  ;;  %1197 = vmatpush3.bf16.msra.mxu1 %v1425_v1 }
  0x71   :  { %1216 = vmatprep.subr.bf16.mxu0 %v1582_v0  ;;  %1198 = vmatprep.mubr.msk.bf16.mxu1 %vm1583_vm0, %v1582_v0 }
  0x72   :  { %1222 = vmatprep.subr.bf16.mxu1 %v1582_v0 }
  0x74   :  { %1217 = vmatpush3.bf16.msra.mxu0 %v1757_v15 }
  0x75   :  { %1242 = vmatprep.subr.bf16.mxu0 %v1582_v0 }
  0x77   :  { %1219 = vmatmul.mubr.bf16.vlgmr.msra.gmra.mrb[8].mxu0 %v496_v18  ;;  %1199 = vmatmul.mubr.msk.bf16.vlgmr.msra.gmra.mrb[20].mxu1 %vm105_vm1, %v433_v19 }
  0x78   :  { %1243 = vmatpush3.bf16.msra.mxu0 %v1712_v5  ;;  %1258 = vmatprep.mubr.msk.bf16.mxu0 %vm1583_vm0, %v1582_v0 }
  0x79   :  { %1244 = vmatprep.subr.bf16.mxu0 %v1582_v0  ;;  %1223 = vmatpush3.bf16.msra.mxu1 %v1712_v5 }
  0x7a   :  { %1238 = vmatprep.mubr.msk.bf16.mxu1 %vm1583_vm0, %v1582_v0  ;;  %1224 = vmatprep.subr.bf16.mxu1 %v1582_v0 }
  0x7c   :  { %1245 = vmatpush3.bf16.msra.mxu0 %v1717_v6 }
  0x7d   :  { %1246 = vmatprep.subr.bf16.mxu0 %v1582_v0  ;;  %1225 = vmatpush3.bf16.msra.mxu1 %v1717_v6 }
  0x7e   :  { %1226 = vmatprep.subr.bf16.mxu1 %v1582_v0 }
  0x80   :  { %1247 = vmatpush3.bf16.msra.mxu0 %v1726_v8 }
  0x81   :  { %1248 = vmatprep.subr.bf16.mxu0 %v1582_v0  ;;  %1227 = vmatpush3.bf16.msra.mxu1 %v1726_v8 }
  0x82   :  { %1228 = vmatprep.subr.bf16.mxu1 %v1582_v0 }
  0x84   :  { %1249 = vmatpush3.bf16.msra.mxu0 %v1733_v9 }
  0x85   :  { %1250 = vmatprep.subr.bf16.mxu0 %v1582_v0  ;;  %1229 = vmatpush3.bf16.msra.mxu1 %v1733_v9 }
  0x86   :  { %1230 = vmatprep.subr.bf16.mxu1 %v1582_v0 }
  0x88   :  { %1251 = vmatpush3.bf16.msra.mxu0 %v1738_v11 }
  0x89   :  { %1252 = vmatprep.subr.bf16.mxu0 %v1582_v0  ;;  %1231 = vmatpush3.bf16.msra.mxu1 %v1738_v11 }
  0x8a   :  { %1232 = vmatprep.subr.bf16.mxu1 %v1582_v0 }
  0x8c   :  { %1253 = vmatpush3.bf16.msra.mxu0 %v1745_v12 }
  0x8d   :  { %1254 = vmatprep.subr.bf16.mxu0 %v1582_v0  ;;  %1233 = vmatpush3.bf16.msra.mxu1 %v1745_v12 }
  0x8e   :  { %1234 = vmatprep.subr.bf16.mxu1 %v1582_v0 }
  0x90   :  { %1255 = vmatpush3.bf16.msra.mxu0 %v1750_v14 }
  0x91   :  { %1256 = vmatprep.subr.bf16.mxu0 %v1582_v0  ;;  %1235 = vmatpush3.bf16.msra.mxu1 %v1750_v14 }
  0x92   :  { %1236 = vmatprep.subr.bf16.mxu1 %v1582_v0 }
  0x94   :  { %1257 = vmatpush3.bf16.msra.mxu0 %v1757_v15 }
  0x95   :  { %1282 = vmatprep.subr.bf16.mxu0 %v1582_v0  ;;  %1237 = vmatpush3.bf16.msra.mxu1 %v1757_v15 }
  0x96   :  { %1262 = vmatprep.subr.bf16.mxu1 %v1582_v0 }
 0x122   :  { %v143_v20 = vpop.f32.mrb[0].mxu1 }
 0x123   :  { %v1158_v21 = vpop.f32.mrb[1].mxu1  ;;  %v144_v29 = vadd.f32 %v1809_v28, %v143_v20 }
 0x124   :  { %v146_v22 = vpop.f32.mrb[2].mxu1  ;;  %v1438_v21 = vld [vmem:[#allocation10 + $0x20] sm:$0xff]  }
 0x125   :  { %v1159_v23 = vpop.f32.mrb[3].mxu1  ;;  %v1439_v22 = vld [vmem:[#allocation10 + $0x28] sm:$0xff]  }
 0x126   :  { %v1440_v23 = vld [vmem:[#allocation10 + $0x30] sm:$0xff]  }
 0x132   :  { %v236_v24 = vpop.f32.mrb[8].mxu1 }
 0x133   :  { %v1170_v25 = vpop.f32.mrb[9].mxu1  ;;  %v237_v44 = vadd.f32 %v1809_v28, %v236_v24  ;;  %v1441_v24 = vld [vmem:[#allocation10 + $0x38] sm:$0xff]  }
 0x134   :  { %v239_v26 = vpop.f32.mrb[10].mxu1 }
 0x135   :  { %v1171_v27 = vpop.f32.mrb[11].mxu1 }
 0x14a   :  { %v579_v30 = vpop.f32.mrb[8].mxu0 }
 0x14b   :  { %v586_v31 = vadd.f32 %v579_v30, %v144_v29  ;;  %v1220_v32 = vpop.f32.mrb[9].mxu0 }
 0x14c   :  { %v582_v33 = vpop.f32.mrb[10].mxu0 }
 0x14d   :  { %1442 = vtanh.f32 %v586_v31  ;;  %v1221_v34 = vpop.f32.mrb[11].mxu0  ;;  %v1048_v33 = vld [vmem:[%s1938_s6] ss:$0 sm:$0xff] }
 0x157   :  { %v1443_v35 = vpop.eup %1442 }
 0x158   :  { %v588_v36 = vpack.c.bf16 %v1443_v35, %v1443_v35 }
 0x15a   :  { %1239 = vmatmul.mubr.bf16.vlgmr.msra.gmra.mrb[4].mxu1 %v588_v36 }
 0x15b   :  { %1263 = vmatpush3.bf16.msra.mxu1 %v1712_v5  ;;  %1278 = vmatprep.mubr.msk.bf16.mxu1 %vm1583_vm0, %v1582_v0 }
 0x15c   :  { %1264 = vmatprep.subr.bf16.mxu1 %v1582_v0 }
 0x15f   :  { %1265 = vmatpush3.bf16.msra.mxu1 %v1717_v6 }
 0x160   :  { %1266 = vmatprep.subr.bf16.mxu1 %v1582_v0 }
 0x163   :  { %1267 = vmatpush3.bf16.msra.mxu1 %v1726_v8 }
 0x164   :  { %1268 = vmatprep.subr.bf16.mxu1 %v1582_v0 }
 0x167   :  { %1269 = vmatpush3.bf16.msra.mxu1 %v1733_v9 }
 0x168   :  { %1270 = vmatprep.subr.bf16.mxu1 %v1582_v0 }
 0x16b   :  { %1271 = vmatpush3.bf16.msra.mxu1 %v1738_v11 }
 0x16c   :  { %1272 = vmatprep.subr.bf16.mxu1 %v1582_v0 }
 0x16f   :  { %1273 = vmatpush3.bf16.msra.mxu1 %v1745_v12 }
 0x170   :  { %1274 = vmatprep.subr.bf16.mxu1 %v1582_v0 }
 0x173   :  { %1275 = vmatpush3.bf16.msra.mxu1 %v1750_v14 }
 0x174   :  { %1276 = vmatprep.subr.bf16.mxu1 %v1582_v0 }
 0x177   :  { %1277 = vmatpush3.bf16.msra.mxu1 %v1757_v15 }
 0x178   :  { %1302 = vmatprep.subr.bf16.mxu1 %v1582_v0 }
 0x22d   :  { %v623_v37 = vpop.f32.mrb[4].mxu1 }
 0x22e   :  { %v1384_v38 = vadd.f32 %v1809_v28, %v623_v37  ;;  %v1240_v39 = vpop.f32.mrb[5].mxu1 }
 0x22f   :  { %v626_v40 = vpop.f32.mrb[6].mxu1 }
 0x230   :  { %1444 = vtanh.f32 %v1384_v38  ;;  %v1241_v41 = vpop.f32.mrb[7].mxu1 }
 0x23a   :  { %v1445_v42 = vpop.eup %1444 }
 0x23b   :  { %v632_v43 = vpack.c.bf16 %v1445_v42, %v1445_v42 }
 0x23d   :  { %1259 = vmatmul.mubr.bf16.vlgmr.msra.gmra.mrb[12].mxu0 %v632_v43 }
 0x23e   :  { %1283 = vmatpush3.bf16.msra.mxu0 %v1712_v5  ;;  %1298 = vmatprep.mubr.msk.bf16.mxu0 %vm1583_vm0, %v1582_v0 }
 0x23f   :  { %1284 = vmatprep.subr.bf16.mxu0 %v1582_v0 }
 0x242   :  { %1285 = vmatpush3.bf16.msra.mxu0 %v1717_v6 }
 0x243   :  { %1286 = vmatprep.subr.bf16.mxu0 %v1582_v0 }
 0x246   :  { %1287 = vmatpush3.bf16.msra.mxu0 %v1726_v8 }
 0x247   :  { %1288 = vmatprep.subr.bf16.mxu0 %v1582_v0 }
 0x24a   :  { %1289 = vmatpush3.bf16.msra.mxu0 %v1733_v9 }
 0x24b   :  { %1290 = vmatprep.subr.bf16.mxu0 %v1582_v0 }
 0x24e   :  { %1291 = vmatpush3.bf16.msra.mxu0 %v1738_v11 }
 0x24f   :  { %1292 = vmatprep.subr.bf16.mxu0 %v1582_v0 }
 0x252   :  { %1293 = vmatpush3.bf16.msra.mxu0 %v1745_v12 }
 0x253   :  { %1294 = vmatprep.subr.bf16.mxu0 %v1582_v0 }
 0x256   :  { %1295 = vmatpush3.bf16.msra.mxu0 %v1750_v14 }
 0x257   :  { %1296 = vmatprep.subr.bf16.mxu0 %v1582_v0 }
 0x25a   :  { %1297 = vmatpush3.bf16.msra.mxu0 %v1757_v15 }
 0x25b   :  { %1322 = vmatprep.subr.bf16.mxu0 %v1582_v0 }
 0x310   :  { %v667_v45 = vpop.f32.mrb[12].mxu0 }
 0x311   :  { %v674_v46 = vadd.f32 %v667_v45, %v237_v44  ;;  %v1260_v47 = vpop.f32.mrb[13].mxu0 }
 0x312   :  { %v670_v48 = vpop.f32.mrb[14].mxu0 }
 0x313   :  { %1446 = vtanh.f32 %v674_v46  ;;  %v1261_v49 = vpop.f32.mrb[15].mxu0 }
 0x31d   :  { %v1447_v50 = vpop.eup %1446 }
 0x31e   :  { %v676_v51 = vpack.c.bf16 %v1447_v50, %v1447_v50 }
 0x320   :  { %1279 = vmatmul.mubr.bf16.vlgmr.msra.gmra.mrb[12].mxu1 %v676_v51 }
 0x321   :  { %1303 = vmatpush3.bf16.msra.mxu1 %v1712_v5  ;;  %1318 = vmatprep.mubr.msk.bf16.mxu1 %vm1583_vm0, %v1582_v0 }
 0x322   :  { %1304 = vmatprep.subr.bf16.mxu1 %v1582_v0 }
 0x325   :  { %1305 = vmatpush3.bf16.msra.mxu1 %v1717_v6 }
 0x326   :  { %1306 = vmatprep.subr.bf16.mxu1 %v1582_v0 }
 0x329   :  { %1307 = vmatpush3.bf16.msra.mxu1 %v1726_v8 }
 0x32a   :  { %1308 = vmatprep.subr.bf16.mxu1 %v1582_v0 }
 0x32d   :  { %1309 = vmatpush3.bf16.msra.mxu1 %v1733_v9 }
 0x32e   :  { %1310 = vmatprep.subr.bf16.mxu1 %v1582_v0 }
 0x331   :  { %1311 = vmatpush3.bf16.msra.mxu1 %v1738_v11 }
 0x332   :  { %1312 = vmatprep.subr.bf16.mxu1 %v1582_v0 }
 0x335   :  { %1313 = vmatpush3.bf16.msra.mxu1 %v1745_v12 }
 0x336   :  { %1314 = vmatprep.subr.bf16.mxu1 %v1582_v0 }
 0x339   :  { %1315 = vmatpush3.bf16.msra.mxu1 %v1750_v14 }
 0x33a   :  { %1316 = vmatprep.subr.bf16.mxu1 %v1582_v0 }
 0x33d   :  { %1317 = vmatpush3.bf16.msra.mxu1 %v1757_v15 }
 0x33e   :  { %1342 = vmatprep.subr.bf16.mxu1 %v1582_v0 }
 0x3f3   :  { %v711_v52 = vpop.f32.mrb[12].mxu1 }
 0x3f4   :  { %v1387_v53 = vadd.f32 %v1809_v28, %v711_v52  ;;  %v1280_v54 = vpop.f32.mrb[13].mxu1 }
 0x3f5   :  { %v714_v55 = vpop.f32.mrb[14].mxu1 }
 0x3f6   :  { %1448 = vtanh.f32 %v1387_v53  ;;  %v1281_v56 = vpop.f32.mrb[15].mxu1 }
 0x400   :  { %v1449_v57 = vpop.eup %1448 }
 0x401   :  { %v720_v58 = vpack.c.bf16 %v1449_v57, %v1449_v57 }
 0x403   :  { %1299 = vmatmul.mubr.bf16.vlgmr.msra.gmra.mrb[0].mxu0 %v720_v58 }
 0x404   :  { %1323 = vmatpush3.bf16.msra.mxu0 %v1712_v5  ;;  %1338 = vmatprep.mubr.msk.bf16.mxu0 %vm1583_vm0, %v1582_v0 }
 0x405   :  { %1324 = vmatprep.subr.bf16.mxu0 %v1582_v0 }
 0x408   :  { %1325 = vmatpush3.bf16.msra.mxu0 %v1717_v6 }
 0x409   :  { %1326 = vmatprep.subr.bf16.mxu0 %v1582_v0 }
 0x40c   :  { %1327 = vmatpush3.bf16.msra.mxu0 %v1726_v8 }
 0x40d   :  { %1328 = vmatprep.subr.bf16.mxu0 %v1582_v0 }
 0x410   :  { %1329 = vmatpush3.bf16.msra.mxu0 %v1733_v9 }
 0x411   :  { %1330 = vmatprep.subr.bf16.mxu0 %v1582_v0 }
 0x414   :  { %1331 = vmatpush3.bf16.msra.mxu0 %v1738_v11 }
 0x415   :  { %1332 = vmatprep.subr.bf16.mxu0 %v1582_v0 }
 0x418   :  { %1333 = vmatpush3.bf16.msra.mxu0 %v1745_v12 }
 0x419   :  { %1334 = vmatprep.subr.bf16.mxu0 %v1582_v0 }
 0x41c   :  { %1335 = vmatpush3.bf16.msra.mxu0 %v1750_v14 }
 0x41d   :  { %1336 = vmatprep.subr.bf16.mxu0 %v1582_v0 }
 0x420   :  { %1337 = vmatpush3.bf16.msra.mxu0 %v1757_v15 }
 0x421   :  { %1362 = vmatprep.subr.bf16.mxu0 %v1582_v0 }
 0x4d6   :  { %v755_v59 = vpop.f32.mrb[0].mxu0 }
 0x4d7   :  { %v1388_v60 = vadd.f32 %v1809_v28, %v755_v59  ;;  %v1300_v61 = vpop.f32.mrb[1].mxu0 }
 0x4d8   :  { %v758_v62 = vpop.f32.mrb[2].mxu0 }
 0x4d9   :  { %1450 = vtanh.f32 %v1388_v60  ;;  %v1301_v63 = vpop.f32.mrb[3].mxu0 }
 0x4e3   :  { %v1451_v1 = vpop.eup %1450 }
 0x4e4   :  { %v764_v2 = vpack.c.bf16 %v1451_v1, %v1451_v1 }
 0x4e6   :  { %1319 = vmatmul.mubr.bf16.vlgmr.msra.gmra.mrb[16].mxu1 %v764_v2 }
 0x4e7   :  { %1343 = vmatpush3.bf16.msra.mxu1 %v1712_v5  ;;  %1358 = vmatprep.mubr.msk.bf16.mxu1 %vm1583_vm0, %v1582_v0 }
 0x4e8   :  { %1344 = vmatprep.subr.bf16.mxu1 %v1582_v0 }
 0x4eb   :  { %1345 = vmatpush3.bf16.msra.mxu1 %v1717_v6 }
 0x4ec   :  { %1346 = vmatprep.subr.bf16.mxu1 %v1582_v0 }
 0x4ef   :  { %1347 = vmatpush3.bf16.msra.mxu1 %v1726_v8 }
 0x4f0   :  { %1348 = vmatprep.subr.bf16.mxu1 %v1582_v0 }
 0x4f3   :  { %1349 = vmatpush3.bf16.msra.mxu1 %v1733_v9 }
 0x4f4   :  { %1350 = vmatprep.subr.bf16.mxu1 %v1582_v0 }
 0x4f7   :  { %1351 = vmatpush3.bf16.msra.mxu1 %v1738_v11  ;;  %v1435_v11 = vld [vmem:[#allocation10 + $0x8] sm:$0xff]  }
 0x4f8   :  { %1352 = vmatprep.subr.bf16.mxu1 %v1582_v0 }
 0x4fb   :  { %1353 = vmatpush3.bf16.msra.mxu1 %v1745_v12  ;;  %v1436_v12 = vld [vmem:[#allocation10 + $0x10] sm:$0xff]  }
 0x4fc   :  { %1354 = vmatprep.subr.bf16.mxu1 %v1582_v0 }
 0x4ff   :  { %1355 = vmatpush3.bf16.msra.mxu1 %v1750_v14 }
 0x500   :  { %1356 = vmatprep.subr.bf16.mxu1 %v1582_v0 }
 0x503   :  { %1357 = vmatpush3.bf16.msra.mxu1 %v1757_v15 }
 0x5b9   :  { %v799_v3 = vpop.f32.mrb[16].mxu1 }
 0x5ba   :  { %v1389_v4 = vadd.f32 %v1809_v28, %v799_v3  ;;  %v1320_v5 = vpop.f32.mrb[17].mxu1 }
 0x5bb   :  { %v802_v6 = vpop.f32.mrb[18].mxu1 }
 0x5bc   :  { %1452 = vtanh.f32 %v1389_v4  ;;  %v1321_v7 = vpop.f32.mrb[19].mxu1 }
 0x5c6   :  { %v1453_v8 = vpop.eup %1452 }
 0x5c7   :  { %v808_v9 = vpack.c.bf16 %v1453_v8, %v1453_v8 }
 0x5c9   :  { %1339 = vmatmul.mubr.bf16.vlgmr.msra.gmra.mrb[4].mxu0 %v808_v9 }
 0x5ca   :  { %1378 = vmatprep.mubr.msk.bf16.mxu0 %vm1583_vm0, %v1582_v0  ;;  %1363 = vmatpush3.bf16.msra.mxu0 %v1434_v10 }
 0x5cb   :  { %1364 = vmatprep.subr.bf16.mxu0 %v1582_v0 }
 0x5ce   :  { %1365 = vmatpush3.bf16.msra.mxu0 %v1435_v11 }
 0x5cf   :  { %1366 = vmatprep.subr.bf16.mxu0 %v1582_v0 }
 0x5d2   :  { %1367 = vmatpush3.bf16.msra.mxu0 %v1436_v12 }
 0x5d3   :  { %1368 = vmatprep.subr.bf16.mxu0 %v1582_v0 }
 0x5d6   :  { %1369 = vmatpush3.bf16.msra.mxu0 %v1437_v13 }
 0x5d7   :  { %1370 = vmatprep.subr.bf16.mxu0 %v1582_v0 }
 0x5da   :  { %1371 = vmatpush3.bf16.msra.mxu0 %v1438_v21 }
 0x5db   :  { %1372 = vmatprep.subr.bf16.mxu0 %v1582_v0 }
 0x5de   :  { %1373 = vmatpush3.bf16.msra.mxu0 %v1439_v22 }
 0x5df   :  { %1374 = vmatprep.subr.bf16.mxu0 %v1582_v0 }
 0x5e2   :  { %1375 = vmatpush3.bf16.msra.mxu0 %v1440_v23 }
 0x5e3   :  { %1376 = vmatprep.subr.bf16.mxu0 %v1582_v0 }
 0x5e6   :  { %1377 = vmatpush3.bf16.msra.mxu0 %v1441_v24 }
 0x69c   :  { %v843_v14 = vpop.f32.mrb[4].mxu0 }
 0x69d   :  { %v1390_v15 = vadd.f32 %v1809_v28, %v843_v14  ;;  %v1340_v16 = vpop.f32.mrb[5].mxu0 }
 0x69e   :  { %v846_v17 = vpop.f32.mrb[6].mxu0 }
 0x69f   :  { %1454 = vtanh.f32 %v1390_v15  ;;  %v1341_v18 = vpop.f32.mrb[7].mxu0 }
 0x6a9   :  { %v1455_v19 = vpop.eup %1454 }
 0x6aa   :  { %v852_v20 = vpack.c.bf16 %v1455_v19, %v1455_v19 }
 0x6ac   :  { %1359 = vmatmul.mubr.bf16.vlgmr.msra.gmra.mrb[20].mxu1 %v852_v20 }
 0x77f   :  { %v887_v25 = vpop.f32.mrb[20].mxu1 }
 0x780   :  { %v1391_v26 = vadd.f32 %v1809_v28, %v887_v25  ;;  %v1360_v27 = vpop.f32.mrb[21].mxu1 }
 0x781   :  { %v890_v29 = vpop.f32.mrb[22].mxu1 }
 0x782   :  { %1456 = vtanh.f32 %v1391_v26  ;;  %v1361_v30 = vpop.f32.mrb[23].mxu1 }
 0x78c   :  { %v1457_v31 = vpop.eup %1456 }
 0x78d   :  { %v916_v32 = vpack.c.bf16 %v1457_v31, %v1457_v31 }
 0x78f   :  { %1379 = vmatmul.mubr.bf16.vlgmr.msra.gmra.mrb[16].mxu0 %v916_v32 }
 0x862   :  { %v1006_v34 = vpop.f32.mrb[16].mxu0 }
 0x863   :  { %v1007_v0 = vadd.f32 %v1048_v33, %v1006_v34  ;;  %v1380_v35 = vpop.f32.mrb[17].mxu0 }
 0x864   :  { %v1009_v36 = vpop.f32.mrb[18].mxu0 }
 0x865   :  { %1012 = vst [vmem:[#allocation12] sm:$0xff] %v1007_v0  ;;  %v1381_v28 = vpop.f32.mrb[19].mxu0 }
 0x866   :  { %1557 = shalt.err (!%p1554_p8)
}
 0x867   :  { %s1558_s6 = scalar_lea.hbm %s1939_s7, 128 }
 0x868   :  { %p1559_p9 = scmp.ne.s32.totalorder %s1939_s7, %s1558_s6  ;;  %p1562_p10 = scmp.lt.u32.totalorder %s1558_s6, %s1939_s7 }
 0x86a   :  { %p1564_p11 = pnand %p1562_p10, %p1559_p9 }
 0x86c   :  { %1567 = shalt.err (!%p1564_p11)
}
 0x86d   :  { %1022 = dma.vmem_to_hbm [thread:$0]  %s1020_s29, 128, %s1939_s7, [#allocation6]  }
 0x86e   :  { %1574 = dma.done.wait [#allocation6], 128  }
 0x86f   :  { %1575 = vsyncadd [#allocation6], 4294967168 }
 0x870   :  { %1026 = vsyncpa [#allocation5], 1 }
 0x871   :  { %1027 = vsyncpa [#allocation8], 1 }
 0x872   :  { %1028 = vsyncpa [#allocation11], 1 }
 0x873   :  { %1029 = vsyncpa [#allocation6], 1 }

</bundles_post_ra>
